<compile_context>
chip_gen: v6e
topology: v6e:2x2x1
jax: 0.10.0
libtpu: 0.0.40
codegen_flags: <defaults>
</compile_context>

<pallas_src>
import jax
import jax.numpy as jnp
from jax.experimental import pallas as pl
from jax.experimental.pallas import tpu as pltpu


def _round_up(x, m):
    return ((x + m - 1) // m) * m


# ----------------------------- Pallas kernel ---------------------------------
def _embed_note_kernel(x_ref, w_ref, b_ref, o_ref):
    # o = relu(x @ W + b); f32 operands, f32 MXU accumulation.
    y = jnp.dot(x_ref[...], w_ref[...], preferred_element_type=jnp.float32)
    y = y + b_ref[...]                       # (tm, Np) + (1, Np) broadcast
    o_ref[...] = jnp.maximum(y, 0.0).astype(o_ref.dtype)


def embed_note_pallas(x_flat, w, b, *, tm=512):
    """relu(x_flat @ w + b) with padded row tiles and a lane-dense output slab.

    x_flat: (M, K) f32, w: (K, N) f32, b: (1, N) f32 -> (M, N) f32.
    Handles arbitrary M (rows padded to the tile) and arbitrary N (columns padded
    to a multiple of 128 for unmasked full-lane stores); padding is sliced off.
    """
    M, K = x_flat.shape
    Kw, N = w.shape
    assert K == Kw and b.shape == (1, N)

    # Lane-dense output: pad N up to a multiple of 128 (zero columns, sliced off).
    Np = _round_up(N, 128)
    if Np != N:
        w = jnp.pad(w, ((0, 0), (0, Np - N)))
        b = jnp.pad(b, ((0, 0), (0, Np - N)))

    # Row tiling: big streaming tiles; small inputs run as a single grid step
    # (avoids paying per-grid-step overhead when there is nothing to pipeline).
    tm_eff = tm if M > tm else max(8, _round_up(M, 8))
    Mp = _round_up(M, tm_eff)
    if Mp != M:
        x_flat = jnp.pad(x_flat, ((0, Mp - M), (0, 0)))

    out = pl.pallas_call(
        _embed_note_kernel,
        out_shape=jax.ShapeDtypeStruct((Mp, Np), x_flat.dtype),
        grid_spec=pltpu.PrefetchScalarGridSpec(
            num_scalar_prefetch=0,
            grid=(Mp // tm_eff,),
            in_specs=[
                pl.BlockSpec((tm_eff, K), lambda i: (i, 0)),   # streamed row tile
                # Weight/bias have constant index_maps and stay resident; at these
                # sizes the extra pipeline buffer is negligible, so pipeline_mode
                # is left at the default for maximum compile compatibility.
                pl.BlockSpec((K, Np), lambda i: (0, 0)),        # full weight
                pl.BlockSpec((1, Np), lambda i: (0, 0)),        # bias
            ],
            out_specs=pl.BlockSpec((tm_eff, Np), lambda i: (i, 0)),
        ),
        compiler_params=pltpu.CompilerParams(
            dimension_semantics=("parallel",)),
    )(x_flat, w, b)

    return out[:M, :N]


# --------------------------- NoteEmbedder (JAX) -------------------------------
class NoteEmbedderJax:
    def __init__(self, net_param, stats):
        self.output_size = net_param["note_size"]
        self.key_to_dim = stats["key_to_dim"]["input"]
        self.ignored_indices = []
        if net_param.get("use_continuos_feature_only", False):
            for key in self.key_to_dim:
                if "unnorm" in key:
                    lo, hi = self.key_to_dim[key]
                    self.ignored_indices += list(range(lo, hi))
        self.full_input_size = net_param["input_size"]
        self.input_size = self.full_input_size - len(self.ignored_indices)

        kept = [i for i in range(self.full_input_size)
                if i not in set(self.ignored_indices)]
        self.kept_indices = jnp.asarray(kept, dtype=jnp.int32)

        # Deterministic parameter init (Linear(input_size, output_size)).
        k0, k1 = jax.random.split(jax.random.PRNGKey(42))
        bound = 1.0 / (self.input_size ** 0.5)
        self.w = jax.random.uniform(
            k0, (self.input_size, self.output_size), jnp.float32, -bound, bound)
        self.b = jax.random.uniform(
            k1, (1, self.output_size), jnp.float32, -bound, bound)

        # Fold the 'unnorm' column drop into the weight: ignored feature columns get
        # zero weight rows. Bit-exact vs. gather-then-matmul and deletes a full
        # HBM read+write pass over the activations.
        self.w_full = (jnp.zeros((self.full_input_size, self.output_size), jnp.float32)
                       .at[self.kept_indices].set(self.w))

    def _embed_note(self, x_data):
        # x_data: (rows, full_input_size); column drop folded into w_full.
        return embed_note_pallas(x_data, self.w_full, self.b)

    def forward(self, x):
        # x: (batch, seq, full_input_size)  [PackedSequence path == flat rows]
        B, T, F = x.shape
        emb = self._embed_note(x.reshape(B * T, F))
        return emb.reshape(B, T, self.output_size)


# --------------------------------- main ---------------------------------------
if __name__ == "__main__":
    # Small synthetic config consistent with the module.
    full_input = 48
    key_to_dim = {
        "midi_pitch": (0, 16),
        "duration": (16, 32),
        "midi_pitch_unnorm": (32, 48),   # dropped when use_continuos_feature_only
    }
    net_param = {
        "note_size": 32,
        "input_size": full_input,
        "use_continuos_feature_only": True,
    }
    stats = {"key_to_dim": {"input": key_to_dim}}

    model = NoteEmbedderJax(net_param, stats)
    assert model.input_size == 32

    # Small demo shape (single grid step path).
    batch, seq = 2, 8
    x = jax.random.normal(jax.random.PRNGKey(0), (batch, seq, full_input), jnp.float32)
    out = jax.block_until_ready(model.forward(x))

    x_sel = jnp.take(x.reshape(batch * seq, full_input), model.kept_indices, axis=1)
    ref = jnp.maximum(x_sel @ model.w + model.b, 0.0).reshape(batch, seq, -1)
    assert out.shape == (batch, seq, net_param["note_size"])
    assert jnp.allclose(out, ref, atol=1e-4, rtol=1e-4)

    # Larger, non-tile-multiple row count exercises the padded multi-tile grid path.
    b2, s2 = 3, 701
    x_big = jax.random.normal(jax.random.PRNGKey(1), (b2, s2, full_input), jnp.float32)
    out_big = jax.block_until_ready(model.forward(x_big))
    x_sel_b = jnp.take(x_big.reshape(b2 * s2, full_input), model.kept_indices, axis=1)
    ref_big = jnp.maximum(x_sel_b @ model.w + model.b, 0.0).reshape(b2, s2, -1)
    assert out_big.shape == (b2, s2, net_param["note_size"])
    assert jnp.allclose(out_big, ref_big, atol=1e-4, rtol=1e-4)

    print("KERNEL_OK")
</pallas_src>

<mosaic_0001>
module attributes {stable_mosaic.version = 11 : i64} {
  func.func @_embed_note_kernel(%arg0: i32, %arg1: memref<16x48xf32, #tpu.memory_space<vmem>>, %arg2: memref<48x128xf32, #tpu.memory_space<vmem>>, %arg3: memref<1x128xf32, #tpu.memory_space<vmem>>, %arg4: memref<16x128xf32, #tpu.memory_space<vmem>>) attributes {dimension_semantics = [#tpu.dimension_semantics<parallel>], iteration_bounds = array<i64: 1>, scalar_prefetch = 0 : i64, scratch_operands = 0 : i64, tpu.core_type = #tpu.core_type<tc>, window_params = [{transform_indices = @transform_0, window_bounds = array<i64: 16, 48>}, {pipeline_mode = #tpu.pipeline_mode<synchronous>, transform_indices = @transform_1, window_bounds = array<i64: 48, 128>}, {pipeline_mode = #tpu.pipeline_mode<synchronous>, transform_indices = @transform_2, window_bounds = array<i64: 1, 128>}, {transform_indices = @transform_3, window_bounds = array<i64: 16, 128>}]} {
    %c0 = arith.constant 0 : index
    %c0_0 = arith.constant 0 : index
    %0 = vector.load %arg1[%c0, %c0_0] : memref<16x48xf32, #tpu.memory_space<vmem>>, vector<16x48xf32>
    %c0_1 = arith.constant 0 : index
    %c0_2 = arith.constant 0 : index
    %1 = vector.load %arg2[%c0_1, %c0_2] : memref<48x128xf32, #tpu.memory_space<vmem>>, vector<48x128xf32>
    %cst = arith.constant dense<0.000000e+00> : vector<16x128xf32>
    %2 = tpu.matmul %0, %1, %cst {dimension_numbers = #tpu.dot_dimension_numbers<[1], [0], [0], [1], [0, 0, 1, 1], [], []>} : vector<16x48xf32>, vector<48x128xf32>, vector<16x128xf32> -> vector<16x128xf32>
    %c0_3 = arith.constant 0 : index
    %c0_4 = arith.constant 0 : index
    %3 = vector.load %arg3[%c0_3, %c0_4] : memref<1x128xf32, #tpu.memory_space<vmem>>, vector<1x128xf32>
    %4 = vector.broadcast %3 : vector<1x128xf32> to vector<16x128xf32>
    %5 = arith.addf %2, %4 : vector<16x128xf32>
    %cst_5 = arith.constant 0.000000e+00 : f32
    %6 = vector.broadcast %cst_5 : f32 to vector<16x128xf32>
    %7 = arith.maximumf %5, %6 : vector<16x128xf32>
    %c0_6 = arith.constant 0 : index
    %c0_7 = arith.constant 0 : index
    %8 = vector.load %arg4[%c0_6, %c0_7] : memref<16x128xf32, #tpu.memory_space<vmem>>, vector<16x128xf32>
    tpu.vector_store %arg4[%c0_6, %c0_7], %7 {strides = array<i32>} : memref<16x128xf32, #tpu.memory_space<vmem>>, vector<16x128xf32>,
    return
  }
  func.func @transform_0(%arg0: i32) -> (i32, i32) {
    %c0_i32 = arith.constant 0 : i32
    %c0_i32_0 = arith.constant 0 : i32
    return %arg0, %c0_i32 : i32, i32
  }
  func.func @transform_1(%arg0: i32) -> (i32, i32) {
    %c0_i32 = arith.constant 0 : i32
    %c0_i32_0 = arith.constant 0 : i32
    %c0_i32_1 = arith.constant 0 : i32
    return %c0_i32, %c0_i32_0 : i32, i32
  }
  func.func @transform_2(%arg0: i32) -> (i32, i32) {
    %c0_i32 = arith.constant 0 : i32
    %c0_i32_0 = arith.constant 0 : i32
    %c0_i32_1 = arith.constant 0 : i32
    return %c0_i32, %c0_i32_0 : i32, i32
  }
  func.func @transform_3(%arg0: i32) -> (i32, i32) {
    %c0_i32 = arith.constant 0 : i32
    %c0_i32_0 = arith.constant 0 : i32
    return %arg0, %c0_i32 : i32, i32
  }
}

</mosaic_0001>

<bundles_post_ra>
// kernel: tpu_custom_call.1
= control target key start
LH: loop header
LB: loop body
LE: loop exit
PB: predicated region body
PF: predicated region fallthrough
CT: control target
= control target key end

     0   :  { %8 = vsyncpa [#allocation3], 0  ;;  %s307_s0 = inlined_call_operand.hbm [shape: f32[16,48], index: 0, kind: input, shape index: {}]   ;;  %s308_s1 = inlined_call_operand.hbm [shape: f32[48,128], index: 1, kind: input, shape index: {}]   ;;  %s309_s2 = inlined_call_operand.vmem [shape: f32[1,128], index: 2, kind: input, shape index: {}]   ;;  %s310_s3 = inlined_call_operand.hbm [shape: f32[16,128], index: 3, kind: output, shape index: {}]  }
   0x1   :  { %9 = vsyncpa [#allocation6], 0 }
   0x2   :  { %10 = vsyncpa [#allocation4], 0  ;;  %s259_s12 = smov [#allocation2]  }
   0x3   :  { %s16_s13 = sshll.u32 %s259_s12, 4  ;;  %s17_s13 = int_to_ptr.vmem [resolvable:$true] %s16_s13 }
   0x4   :  { %s201_s14 = scalar_lea.vmem %s17_s13, 256  ;;  %p206_p1 = scmp.lt.s32.totalorder %s17_s13, %s17_s13 }
   0x5   :  { %p202_p0 = scmp.ne.s32.totalorder %s17_s13, %s201_s14  ;;  %p207_p2 = scmp.lt.s32.totalorder %s201_s14, %s201_s14 }
   0x7   :  { %p208_p3 = por %p207_p2, %p206_p1 }
   0x9   :  { %p209_p4 = pnand %p208_p3, %p202_p0 }
   0xb   :  { %212 = shalt.err (!%p209_p4)
}
   0xc   :  { %s260_s15 = smov 128   ;;  %s261_s16 = smov 8  }
   0xd   :  { %22 = dma.hbm_to_vmem [thread:$0]  %s307_s0, 256, %s17_s13, [#allocation3], %s260_s15, %s260_s15, %s261_s16  }
   0xe   :  { %s262_s19 = smov [#allocation5]  }
   0xf   :  { %s28_s20 = sshll.u32 %s262_s19, 4  ;;  %s29_s20 = int_to_ptr.vmem [resolvable:$true] %s28_s20 }
  0x10   :  { %s221_s21 = scalar_lea.vmem %s29_s20, 768  ;;  %p226_p6 = scmp.lt.s32.totalorder %s29_s20, %s29_s20 }
  0x11   :  { %p222_p5 = scmp.ne.s32.totalorder %s29_s20, %s221_s21  ;;  %p227_p7 = scmp.lt.s32.totalorder %s221_s21, %s221_s21 }
  0x13   :  { %p228_p8 = por %p227_p7, %p226_p6 }
  0x15   :  { %p229_p9 = pnand %p228_p8, %p222_p5 }
  0x17   :  { %232 = shalt.err (!%p229_p9)
}
  0x18   :  { %34 = dma.hbm_to_vmem [thread:$0]  %s308_s1, 768, %s29_s20, [#allocation6], %s260_s15, %s260_s15, %s261_s16  }
  0x19   :  { %253 = dma.done.wait [#allocation3], 256  }
  0x1a   :  { %254 = vsyncadd [#allocation3], 4294967040 }
  0x1b   :  { %255 = dma.done.wait [#allocation6], 768  }
  0x1c   :  { %256 = vsyncadd [#allocation6], 4294966528  ;;  %v50_v0 = vld [vmem:[#allocation5 + $0x28] sm:$0xff]  ;;  %v49_v1 = vld [vmem:[#allocation5 + $0x20] sm:$0xff]  ;;  %vm58_vm0 = vcmask 392192   ;;  %s263_s24 = smov [#allocation7]  }
  0x1d   :  { %173 = vmatprep.subr.mxu0 %v50_v0  ;;  %v48_v2 = vld [vmem:[#allocation5 + $0x18] sm:$0xff]  ;;  %v43_v3 = vld [vmem:[#allocation2] sm:$0xff]  ;;  %v46_v5 = vld [vmem:[#allocation5 + $0x8] sm:$0xff]  ;;  %s149_s25 = sshll.u32 %s263_s24, 4  ;;  %s150_s25 = int_to_ptr.vmem [resolvable:$true] %s149_s25 }
  0x1e   :  { %174 = vmatpush3.msra.mxu0 %v50_v0  ;;  %185 = vmatprep.mubr.msk.f32.mxu0 %vm58_vm0, %v43_v3  ;;  %v47_v4 = vld [vmem:[#allocation5 + $0x10] sm:$0xff]  ;;  %v45_v6 = vld [vmem:[#allocation5] sm:$0xff]  ;;  %v44_v7 = vld [vmem:[#allocation2 + $0x8] sm:$0xff]  ;;  %s233_s26 = scalar_lea.vmem %s150_s25, 256  ;;  %p238_p11 = scmp.lt.s32.totalorder %s150_s25, %s150_s25 }
  0x1f   :  { %175 = vmatprep.subr.mxu0 %v49_v1  ;;  %v162_v8 = vld [vmem:[%s309_s2] ss:$0 sm:$0xff]  ;;  %p234_p10 = scmp.ne.s32.totalorder %s150_s25, %s233_s26  ;;  %p239_p12 = scmp.lt.s32.totalorder %s233_s26, %s233_s26 }
  0x20   :  { %176 = vmatpush3.msra.mxu0 %v49_v1 }
  0x21   :  { %177 = vmatprep.subr.mxu0 %v48_v2  ;;  %p240_p13 = por %p239_p12, %p238_p11 }
  0x22   :  { %178 = vmatpush3.msra.mxu0 %v48_v2 }
  0x23   :  { %179 = vmatprep.subr.mxu0 %v47_v4  ;;  %p241_p0 = pnand %p240_p13, %p234_p10 }
  0x24   :  { %180 = vmatpush3.msra.mxu0 %v47_v4 }
  0x25   :  { %181 = vmatprep.subr.mxu0 %v46_v5 }
  0x26   :  { %182 = vmatpush3.msra.mxu0 %v46_v5 }
  0x27   :  { %183 = vmatprep.subr.mxu0 %v45_v6 }
  0x28   :  { %184 = vmatpush3.msra.mxu0 %v45_v6 }
  0x29   :  { %186 = vmatmul.mubr.msk.f32.vlgmr.msra.gmra.mxu0 %vm58_vm0, %v44_v7 }
  0xe9   :  { %v187_v9 = vpop.f32.mrf.mxu0 }
  0xea   :  { %v137_v10 = vadd.f32 %v187_v9, %v162_v8 }
  0xeb   :  { %v131_v11 = vpop.f32.mrf.mxu0 }
  0xec   :  { %v141_v12 = vmax.f32 %v137_v10, 0.0  ;;  %v132_v13 = vadd.f32 %v162_v8, %v131_v11 }
  0xee   :  { %143 = vst [vmem:[#allocation7 + $0x8] sm:$0xff] %v141_v12  ;;  %v140_v14 = vmax.f32 %v132_v13, 0.0 }
  0xf0   :  { %142 = vst [vmem:[#allocation7] sm:$0xff] %v140_v14 }
  0xf1   :  { %244 = shalt.err (!%p241_p0)
}
  0xf2   :  { %155 = dma.vmem_to_hbm [thread:$0]  %s150_s25, 256, %s310_s3, [#allocation4], %s260_s15, %s260_s15, %s261_s16  }
  0xf3   :  { %257 = dma.done.wait [#allocation4], 256  }
  0xf4   :  { %258 = vsyncadd [#allocation4], 4294967040 }
  0xf5   :  { %159 = vsyncpa [#allocation3], 1 }
  0xf6   :  { %160 = vsyncpa [#allocation6], 1 }
  0xf7   :  { %161 = vsyncpa [#allocation4], 1 }

</bundles_post_ra>
